<compile_context>
chip_gen: v6e
topology: v6e:2x2x1
jax: 0.10.0
libtpu: 0.0.40
codegen_flags: <defaults>
</compile_context>

<pallas_src>
import functools
import math

import jax
import jax.numpy as jnp
from jax.experimental import pallas as pl
from jax.experimental.pallas import tpu as pltpu

_LANE = 128
_SUBLANE = 8


def _round_up(a, b):
    return (a + b - 1) // b * b


def _apply_act(h, act):
    if act == "gelu":
        # Exact erf-based GELU: matches torch.nn.GELU() default.
        return 0.5 * h * (1.0 + jax.lax.erf(h * (1.0 / math.sqrt(2.0))))
    elif act == "relu":
        return jnp.maximum(h, 0.0)
    raise ValueError(f"unsupported act: {act}")


def _vmem_limit_bytes():
    """~75% of physical VMEM per core (128 MiB v5e/v6e, 64 MiB v7x)."""
    try:
        cap = pltpu.get_tpu_info().vmem_capacity_bytes
    except Exception:
        cap = 64 * 1024 * 1024  # conservative (v7x-sized) fallback
    return int(cap * 0.75)


def _choose_tiles(M, H_pad, I_pad, in_size, budget, tm_target=512):
    """Pick (row tile tm, inner tile ti) fitting the VMEM budget.

    Prefers a large row tile (256-1024 range per the roofline measurements)
    and whole-I weight tiles (single k step when everything fits)."""
    tm = _round_up(min(tm_target, _round_up(M, _SUBLANE)), _SUBLANE)
    ti = I_pad

    def est(tm, ti):
        # Double-buffered weight / bias blocks (default pipelining).
        w_bytes = 2 * (2 * H_pad * ti * in_size + ti * 4 + H_pad * 4)
        x_bytes = 2 * tm * H_pad * in_size        # double-buffered input rows
        o_bytes = 2 * tm * H_pad * out_sz         # double-buffered output rows
        acc_bytes = tm * H_pad * 4                # f32 accumulator scratch
        h_bytes = 2 * tm * ti * 4                 # fc1 / activation temporaries
        return w_bytes + x_bytes + o_bytes + acc_bytes + h_bytes

    out_sz = 4
    # Shrink the inner (I) tile first, then the row tile.
    while est(tm, ti) > budget and ti > _LANE and (ti // 2) % _LANE == 0:
        ti //= 2
    while est(tm, ti) > budget and tm > _SUBLANE:
        tm = max(_SUBLANE, _round_up(tm // 2, _SUBLANE))
    return tm, ti


def _ffn_kernel(x_ref, w1_ref, b1_ref, w2_ref, b2_ref, o_ref, acc_ref, *, act):
    k = pl.program_id(1)

    # Accumulator init with the fc2 bias (hoists the bias add off the
    # per-step MXU path).
    @pl.when(k == 0)
    def _init():
        acc_ref[...] = jnp.broadcast_to(b2_ref[...], acc_ref.shape)

    # fc1 tile: (tm, H) @ (H, ti) -> f32; bias add + activation in f32.
    h = jnp.dot(x_ref[...], w1_ref[...], preferred_element_type=jnp.float32)
    h = _apply_act(h + b1_ref[...], act)

    # fc2 partial: (tm, ti) @ (ti, H), accumulated in f32.
    acc_ref[...] += jnp.dot(h.astype(w2_ref.dtype), w2_ref[...],
                            preferred_element_type=jnp.float32)

    @pl.when(k == pl.num_programs(1) - 1)
    def _finalize():
        o_ref[...] = acc_ref[...].astype(o_ref.dtype)


def ffn_pallas(x, w1, b1, w2, b2, *, act="gelu", tm=None, ti=None,
               compute_dtype=None):
    """x: (B, S, H); w1: (H, I); b1: (I,); w2: (I, H); b2: (H,)."""
    B, S, H = x.shape
    Hi, I = w1.shape
    assert Hi == H and w2.shape == (I, H) and b1.shape == (I,) and b2.shape == (H,)
    M = B * S

    out_dtype = x.dtype
    cdt = compute_dtype if compute_dtype is not None else x.dtype
    in_size = jnp.dtype(cdt).itemsize

    # Lane-dense padding: last dims to multiples of 128.
    H_pad = _round_up(H, _LANE)
    I_pad = _round_up(I, _LANE)

    vmem_limit = _vmem_limit_bytes()
    auto_tm, auto_ti = _choose_tiles(M, H_pad, I_pad, in_size,
                                     budget=int(vmem_limit * 0.8))
    tm = auto_tm if tm is None else tm
    ti = auto_ti if ti is None else ti
    tm = _round_up(min(tm, _round_up(M, _SUBLANE)), _SUBLANE)
    ti = _round_up(min(ti, I_pad), _LANE)
    I_pad = _round_up(I_pad, ti)
    M_pad = _round_up(M, tm)

    n_m = M_pad // tm
    n_k = I_pad // ti

    # Zero-pad operands (exact: padded weight rows/cols and biases are zero).
    x2 = jnp.pad(x.reshape(M, H), ((0, M_pad - M), (0, H_pad - H))).astype(cdt)
    w1p = jnp.pad(w1, ((0, H_pad - H), (0, I_pad - I))).astype(cdt)
    w2p = jnp.pad(w2, ((0, I_pad - I), (0, H_pad - H))).astype(cdt)
    b1p = jnp.pad(b1, (0, I_pad - I)).reshape(1, I_pad).astype(jnp.float32)
    b2p = jnp.pad(b2, (0, H_pad - H)).reshape(1, H_pad).astype(jnp.float32)

    grid_spec = pltpu.PrefetchScalarGridSpec(
        num_scalar_prefetch=0,
        grid=(n_m, n_k),
        in_specs=[
            pl.BlockSpec((tm, H_pad), lambda i, k: (i, 0)),   # x row tile
            pl.BlockSpec((H_pad, ti), lambda i, k: (0, k)),   # w1 inner tile
            pl.BlockSpec((1, ti), lambda i, k: (0, k)),       # b1 inner tile
            pl.BlockSpec((ti, H_pad), lambda i, k: (k, 0)),   # w2 inner tile
            pl.BlockSpec((1, H_pad), lambda i, k: (0, 0)),    # b2 (constant)
        ],
        out_specs=pl.BlockSpec((tm, H_pad), lambda i, k: (i, 0)),
        scratch_shapes=[pltpu.VMEM((tm, H_pad), jnp.float32)],
    )

    out = pl.pallas_call(
        functools.partial(_ffn_kernel, act=act),
        out_shape=jax.ShapeDtypeStruct((M_pad, H_pad), out_dtype),
        grid_spec=grid_spec,
        compiler_params=pltpu.CompilerParams(
            dimension_semantics=("parallel", "arbitrary"),
            vmem_limit_bytes=vmem_limit,
        ),
    )(x2, w1p, b1p, w2p, b2p)

    return out[:M, :H].reshape(B, S, H)


def ffn_reference(x, w1, b1, w2, b2, act="gelu"):
    h = _apply_act(x @ w1 + b1, act)
    return h @ w2 + b2


def init_linear_params(key, in_features, out_features):
    # Mimics torch.nn.Linear default init: U(-1/sqrt(in), 1/sqrt(in)).
    kw, kb = jax.random.split(key)
    bound = 1.0 / math.sqrt(in_features)
    # PyTorch stores weight as (out, in); we keep (in, out) for the kernel.
    w = jax.random.uniform(kw, (in_features, out_features), jnp.float32,
                           minval=-bound, maxval=bound)
    b = jax.random.uniform(kb, (out_features,), jnp.float32,
                           minval=-bound, maxval=bound)
    return w, b


if __name__ == "__main__":
    keys = jax.random.split(jax.random.PRNGKey(0), 6)

    # --- small shapes consistent with the module (hidden=32, inner=64) ---
    B, S, H, I = 2, 8, 32, 64
    x = jax.random.normal(keys[0], (B, S, H), jnp.float32)
    w1, b1 = init_linear_params(keys[1], H, I)   # fc1: hidden -> inner
    w2, b2 = init_linear_params(keys[2], I, H)   # fc2: inner -> hidden

    out = jax.block_until_ready(ffn_pallas(x, w1, b1, w2, b2, act="gelu"))
    ref = ffn_reference(x, w1, b1, w2, b2, act="gelu")
    assert out.shape == (B, S, H)
    assert jnp.allclose(out, ref, atol=1e-5, rtol=1e-5), "gelu f32 mismatch"

    out_r = jax.block_until_ready(ffn_pallas(x, w1, b1, w2, b2, act="relu"))
    ref_r = ffn_reference(x, w1, b1, w2, b2, act="relu")
    assert jnp.allclose(out_r, ref_r, atol=1e-5, rtol=1e-5), "relu f32 mismatch"

    # --- 128-aligned shapes exercising the I-reduction grid (ti < I) ---
    B2, S2, H2, I2 = 2, 64, 256, 512
    x2 = jax.random.normal(keys[3], (B2, S2, H2), jnp.float32)
    w1b, b1b = init_linear_params(keys[4], H2, I2)
    w2b, b2b = init_linear_params(keys[5], I2, H2)
    ref2 = ffn_reference(x2, w1b, b1b, w2b, b2b, act="gelu")

    out2 = jax.block_until_ready(
        ffn_pallas(x2, w1b, b1b, w2b, b2b, act="gelu", ti=256))
    assert jnp.allclose(out2, ref2, atol=1e-2, rtol=1e-2), "tiled-I mismatch"

    print("KERNEL_OK")
</pallas_src>

<mosaic_0001>
module attributes {stable_mosaic.version = 11 : i64} {
  func.func @_ffn_kernel(%arg0: i32, %arg1: i32, %arg2: memref<16x128xf32, #tpu.memory_space<vmem>>, %arg3: memref<128x128xf32, #tpu.memory_space<vmem>>, %arg4: memref<1x128xf32, #tpu.memory_space<vmem>>, %arg5: memref<128x128xf32, #tpu.memory_space<vmem>>, %arg6: memref<1x128xf32, #tpu.memory_space<vmem>>, %arg7: memref<16x128xf32, #tpu.memory_space<vmem>>, %arg8: memref<16x128xf32, #tpu.memory_space<vmem>>) attributes {dimension_semantics = [#tpu.dimension_semantics<parallel>, #tpu.dimension_semantics<arbitrary>], iteration_bounds = array<i64: 1, 1>, scalar_prefetch = 0 : i64, scratch_operands = 1 : i64, tpu.core_type = #tpu.core_type<tc>, window_params = [{transform_indices = @transform_0, window_bounds = array<i64: 16, 128>}, {transform_indices = @transform_1, window_bounds = array<i64: 128, 128>}, {transform_indices = @transform_2, window_bounds = array<i64: 1, 128>}, {transform_indices = @transform_3, window_bounds = array<i64: 128, 128>}, {pipeline_mode = #tpu.pipeline_mode<synchronous>, transform_indices = @transform_4, window_bounds = array<i64: 1, 128>}, {transform_indices = @transform_5, window_bounds = array<i64: 16, 128>}]} {
    %c0_i32 = arith.constant 0 : i32
    %0 = arith.cmpi eq, %arg1, %c0_i32 : i32
    %1 = arith.extui %0 : i1 to i32
    %c0_i32_0 = arith.constant 0 : i32
    %2 = arith.cmpi ne, %1, %c0_i32_0 : i32
    scf.if %2 {
      %c0_18 = arith.constant 0 : index
      %c0_19 = arith.constant 0 : index
      %25 = vector.load %arg6[%c0_18, %c0_19] : memref<1x128xf32, #tpu.memory_space<vmem>>, vector<1x128xf32>
      %26 = vector.shape_cast %25 : vector<1x128xf32> to vector<1x128xf32>
      %27 = vector.broadcast %26 : vector<1x128xf32> to vector<16x128xf32>
      %c0_20 = arith.constant 0 : index
      %c0_21 = arith.constant 0 : index
      %28 = vector.load %arg8[%c0_20, %c0_21] : memref<16x128xf32, #tpu.memory_space<vmem>>, vector<16x128xf32>
      tpu.vector_store %arg8[%c0_20, %c0_21], %27 {strides = array<i32>} : memref<16x128xf32, #tpu.memory_space<vmem>>, vector<16x128xf32>,
    } else {
    }
    %c0 = arith.constant 0 : index
    %c0_1 = arith.constant 0 : index
    %3 = vector.load %arg2[%c0, %c0_1] : memref<16x128xf32, #tpu.memory_space<vmem>>, vector<16x128xf32>
    %c0_2 = arith.constant 0 : index
    %c0_3 = arith.constant 0 : index
    %4 = vector.load %arg3[%c0_2, %c0_3] : memref<128x128xf32, #tpu.memory_space<vmem>>, vector<128x128xf32>
    %cst = arith.constant dense<0.000000e+00> : vector<16x128xf32>
    %5 = tpu.matmul %3, %4, %cst {dimension_numbers = #tpu.dot_dimension_numbers<[1], [0], [0], [1], [0, 0, 1, 1], [], []>} : vector<16x128xf32>, vector<128x128xf32>, vector<16x128xf32> -> vector<16x128xf32>
    %c0_4 = arith.constant 0 : index
    %c0_5 = arith.constant 0 : index
    %6 = vector.load %arg4[%c0_4, %c0_5] : memref<1x128xf32, #tpu.memory_space<vmem>>, vector<1x128xf32>
    %7 = vector.broadcast %6 : vector<1x128xf32> to vector<16x128xf32>
    %8 = arith.addf %5, %7 : vector<16x128xf32>
    %cst_6 = arith.constant 5.000000e-01 : f32
    %9 = vector.broadcast %cst_6 : f32 to vector<16x128xf32>
    %10 = arith.mulf %9, %8 : vector<16x128xf32>
    %cst_7 = arith.constant 0.707106769 : f32
    %11 = vector.broadcast %cst_7 : f32 to vector<16x128xf32>
    %12 = arith.mulf %8, %11 : vector<16x128xf32>
    %13 = math.erf %12 : vector<16x128xf32>
    %cst_8 = arith.constant 1.000000e+00 : f32
    %14 = vector.broadcast %cst_8 : f32 to vector<16x128xf32>
    %15 = arith.addf %14, %13 : vector<16x128xf32>
    %16 = arith.mulf %10, %15 : vector<16x128xf32>
    %c0_9 = arith.constant 0 : index
    %c0_10 = arith.constant 0 : index
    %17 = vector.load %arg8[%c0_9, %c0_10] : memref<16x128xf32, #tpu.memory_space<vmem>>, vector<16x128xf32>
    %c0_11 = arith.constant 0 : index
    %c0_12 = arith.constant 0 : index
    %18 = vector.load %arg5[%c0_11, %c0_12] : memref<128x128xf32, #tpu.memory_space<vmem>>, vector<128x128xf32>
    %cst_13 = arith.constant dense<0.000000e+00> : vector<16x128xf32>
    %19 = tpu.matmul %16, %18, %cst_13 {dimension_numbers = #tpu.dot_dimension_numbers<[1], [0], [0], [1], [0, 0, 1, 1], [], []>} : vector<16x128xf32>, vector<128x128xf32>, vector<16x128xf32> -> vector<16x128xf32>
    %20 = arith.addf %17, %19 : vector<16x128xf32>
    %c0_14 = arith.constant 0 : index
    %c0_15 = arith.constant 0 : index
    %21 = vector.load %arg8[%c0_14, %c0_15] : memref<16x128xf32, #tpu.memory_space<vmem>>, vector<16x128xf32>
    tpu.vector_store %arg8[%c0_14, %c0_15], %20 {strides = array<i32>} : memref<16x128xf32, #tpu.memory_space<vmem>>, vector<16x128xf32>,
    %c0_i32_16 = arith.constant 0 : i32
    %22 = arith.cmpi eq, %arg1, %c0_i32_16 : i32
    %23 = arith.extui %22 : i1 to i32
    %c0_i32_17 = arith.constant 0 : i32
    %24 = arith.cmpi ne, %23, %c0_i32_17 : i32
    scf.if %24 {
      %c0_18 = arith.constant 0 : index
      %c0_19 = arith.constant 0 : index
      %25 = vector.load %arg8[%c0_18, %c0_19] : memref<16x128xf32, #tpu.memory_space<vmem>>, vector<16x128xf32>
      %c0_20 = arith.constant 0 : index
      %c0_21 = arith.constant 0 : index
      %26 = vector.load %arg7[%c0_20, %c0_21] : memref<16x128xf32, #tpu.memory_space<vmem>>, vector<16x128xf32>
      tpu.vector_store %arg7[%c0_20, %c0_21], %25 {strides = array<i32>} : memref<16x128xf32, #tpu.memory_space<vmem>>, vector<16x128xf32>,
    } else {
    }
    return
  }
  func.func @transform_0(%arg0: i32, %arg1: i32) -> (i32, i32) {
    %c0_i32 = arith.constant 0 : i32
    %c0_i32_0 = arith.constant 0 : i32
    return %arg0, %c0_i32 : i32, i32
  }
  func.func @transform_1(%arg0: i32, %arg1: i32) -> (i32, i32) {
    %c0_i32 = arith.constant 0 : i32
    %c0_i32_0 = arith.constant 0 : i32
    return %c0_i32, %arg1 : i32, i32
  }
  func.func @transform_2(%arg0: i32, %arg1: i32) -> (i32, i32) {
    %c0_i32 = arith.constant 0 : i32
    %c0_i32_0 = arith.constant 0 : i32
    return %c0_i32, %arg1 : i32, i32
  }
  func.func @transform_3(%arg0: i32, %arg1: i32) -> (i32, i32) {
    %c0_i32 = arith.constant 0 : i32
    %c0_i32_0 = arith.constant 0 : i32
    return %arg1, %c0_i32 : i32, i32
  }
  func.func @transform_4(%arg0: i32, %arg1: i32) -> (i32, i32) {
    %c0_i32 = arith.constant 0 : i32
    %c0_i32_0 = arith.constant 0 : i32
    %c0_i32_1 = arith.constant 0 : i32
    return %c0_i32, %c0_i32_0 : i32, i32
  }
  func.func @transform_5(%arg0: i32, %arg1: i32) -> (i32, i32) {
    %c0_i32 = arith.constant 0 : i32
    %c0_i32_0 = arith.constant 0 : i32
    return %arg0, %c0_i32 : i32, i32
  }
}

</mosaic_0001>

<bundles_post_ra>
// kernel: tpu_custom_call.1
= control target key start
LH: loop header
LB: loop body
LE: loop exit
PB: predicated region body
PF: predicated region fallthrough
CT: control target
= control target key end

     0   :  { %10 = vsyncpa [#allocation4], 0  ;;  %s577_s0 = inlined_call_operand.hbm [shape: f32[16,128], index: 0, kind: input, shape index: {}]   ;;  %s578_s1 = inlined_call_operand.hbm [shape: f32[128,128], index: 1, kind: input, shape index: {}]   ;;  %s579_s2 = inlined_call_operand.vmem [shape: f32[1,128], index: 2, kind: input, shape index: {}]   ;;  %s580_s3 = inlined_call_operand.hbm [shape: f32[128,128], index: 3, kind: input, shape index: {}]   ;;  %s581_s4 = inlined_call_operand.vmem [shape: f32[1,128], index: 4, kind: input, shape index: {}]   ;;  %s582_s5 = inlined_call_operand.hbm [shape: f32[16,128], index: 5, kind: output, shape index: {}]  }
   0x1   :  { %11 = vsyncpa [#allocation7], 0 }
   0x2   :  { %12 = vsyncpa [#allocation5], 0  ;;  %s511_s18 = smov [#allocation6]   ;;  %s512_s20 = smov [#allocation3]  }
   0x3   :  { %s30_s19 = sshll.u32 %s511_s18, 4  ;;  %s18_s21 = sshll.u32 %s512_s20, 4  ;;  %s31_s19 = int_to_ptr.vmem [resolvable:$true] %s30_s19  ;;  %s19_s21 = int_to_ptr.vmem [resolvable:$true] %s18_s21 }
   0x4   :  { %s433_s22 = scalar_lea.vmem %s31_s19, 2048  ;;  %p438_p1 = scmp.lt.s32.totalorder %s31_s19, %s31_s19 }
   0x5   :  { %p434_p0 = scmp.ne.s32.totalorder %s31_s19, %s433_s22  ;;  %p439_p2 = scmp.lt.s32.totalorder %s433_s22, %s433_s22 }
   0x7   :  { %p440_p3 = por %p439_p2, %p438_p1 }
   0x9   :  { %p441_p4 = pnand %p440_p3, %p434_p0 }
   0xb   :  { %444 = shalt.err (!%p441_p4)
}
   0xc   :  { %s513_s23 = smov 128   ;;  %s514_s24 = smov 8  }
   0xd   :  { %36 = dma.hbm_to_vmem [thread:$0]  %s578_s1, 2048, %s31_s19, [#allocation7], %s513_s23, %s513_s23, %s514_s24  }
   0xe   :  { %s453_s27 = scalar_lea.vmem %s19_s21, 256  ;;  %p458_p6 = scmp.lt.s32.totalorder %s19_s21, %s19_s21 }
   0xf   :  { %p454_p5 = scmp.ne.s32.totalorder %s19_s21, %s453_s27  ;;  %p459_p7 = scmp.lt.s32.totalorder %s453_s27, %s453_s27 }
  0x11   :  { %p460_p8 = por %p459_p7, %p458_p6 }
  0x13   :  { %p461_p9 = pnand %p460_p8, %p454_p5 }
  0x15   :  { %464 = shalt.err (!%p461_p9)
}
  0x16   :  { %24 = dma.hbm_to_vmem [thread:$0]  %s577_s0, 256, %s19_s21, [#allocation4], %s513_s23, %s513_s23, %s514_s24  }
  0x17   :  { %s515_s30 = smov [#allocation8]  }
  0x18   :  { %s44_s6 = sshll.u32 %s515_s30, 4  ;;  %s45_s6 = int_to_ptr.vmem [resolvable:$true] %s44_s6 }
  0x19   :  { %s473_s7 = scalar_lea.vmem %s45_s6, 2048  ;;  %p478_p11 = scmp.lt.s32.totalorder %s45_s6, %s45_s6 }
  0x1a   :  { %p474_p10 = scmp.ne.s32.totalorder %s45_s6, %s473_s7  ;;  %p479_p12 = scmp.lt.s32.totalorder %s473_s7, %s473_s7 }
  0x1c   :  { %p480_p13 = por %p479_p12, %p478_p11 }
  0x1e   :  { %p481_p0 = pnand %p480_p13, %p474_p10 }
  0x20   :  { %484 = shalt.err (!%p481_p0)
}
  0x21   :  { %50 = dma.hbm_to_vmem [thread:$0]  %s580_s3, 2048, %s45_s6, [#allocation7], %s513_s23, %s513_s23, %s514_s24  }
  0x22   :  { %505 = dma.done.wait [#allocation4], 256  }
  0x23   :  { %506 = vsyncadd [#allocation4], 4294967040 }
  0x24   :  { %507 = dma.done.wait [#allocation7], 4096  }
  0x25   :  { %508 = vsyncadd [#allocation7], 4294963200  ;;  %v92_v0 = vld [vmem:[#allocation6 + $0x78] sm:$0xff]  ;;  %v91_v1 = vld [vmem:[#allocation6 + $0x70] sm:$0xff]  ;;  %s516_s10 = smov [#allocation9]  }
  0x26   :  { %345 = vmatprep.subr.mxu0 %v92_v0  ;;  %v90_v2 = vld [vmem:[#allocation6 + $0x68] sm:$0xff]  ;;  %v89_v3 = vld [vmem:[#allocation6 + $0x60] sm:$0xff]  ;;  %v75_v4 = vld [vmem:[#allocation3] sm:$0xff]  ;;  %s294_s11 = sshll.u32 %s516_s10, 4  ;;  %s295_s11 = int_to_ptr.vmem [resolvable:$true] %s294_s11 }
  0x27   :  { %346 = vmatpush3.msra.mxu0 %v92_v0  ;;  %v88_v5 = vld [vmem:[#allocation6 + $0x58] sm:$0xff]  ;;  %377 = vmatprep.mubr.f32.mxu0 %v75_v4  ;;  %v201_v7 = vld [vmem:[#allocation8 + $0x70] sm:$0xff]  ;;  %v200_v9 = vld [vmem:[#allocation8 + $0x68] sm:$0xff]  ;;  %s485_s12 = scalar_lea.vmem %s295_s11, 256  ;;  %p490_p2 = scmp.lt.s32.totalorder %s295_s11, %s295_s11 }
  0x28   :  { %347 = vmatprep.subr.mxu0 %v91_v1  ;;  %v202_v6 = vld [vmem:[#allocation8 + $0x78] sm:$0xff]  ;;  %v87_v8 = vld [vmem:[#allocation6 + $0x50] sm:$0xff]  ;;  %v86_v10 = vld [vmem:[#allocation6 + $0x48] sm:$0xff]  ;;  %p486_p1 = scmp.ne.s32.totalorder %s295_s11, %s485_s12  ;;  %p491_p3 = scmp.lt.s32.totalorder %s485_s12, %s485_s12 }
  0x29   :  { %348 = vmatpush3.msra.mxu0 %v91_v1  ;;  %380 = vmatprep.subr.mxu1 %v202_v6  ;;  %v85_v11 = vld [vmem:[#allocation6 + $0x40] sm:$0xff]  ;;  %v84_v12 = vld [vmem:[#allocation6 + $0x38] sm:$0xff]  ;;  %v83_v13 = vld [vmem:[#allocation6 + $0x30] sm:$0xff] }
  0x2a   :  { %349 = vmatprep.subr.mxu0 %v90_v2  ;;  %381 = vmatpush3.msra.mxu1 %v202_v6  ;;  %v82_v14 = vld [vmem:[#allocation6 + $0x28] sm:$0xff]  ;;  %v81_v15 = vld [vmem:[#allocation6 + $0x20] sm:$0xff]  ;;  %v80_v16 = vld [vmem:[#allocation6 + $0x18] sm:$0xff]  ;;  %p492_p4 = por %p491_p3, %p490_p2 }
  0x2b   :  { %350 = vmatpush3.msra.mxu0 %v90_v2  ;;  %382 = vmatprep.subr.mxu1 %v201_v7  ;;  %v79_v17 = vld [vmem:[#allocation6 + $0x10] sm:$0xff]  ;;  %v78_v18 = vld [vmem:[#allocation6 + $0x8] sm:$0xff]  ;;  %v77_v19 = vld [vmem:[#allocation6] sm:$0xff] }
  0x2c   :  { %351 = vmatprep.subr.mxu0 %v89_v3  ;;  %383 = vmatpush3.msra.mxu1 %v201_v7  ;;  %v76_v20 = vld [vmem:[#allocation3 + $0x8] sm:$0xff]  ;;  %v199_v21 = vld [vmem:[#allocation8 + $0x60] sm:$0xff]  ;;  %v197_v23 = vld [vmem:[#allocation8 + $0x50] sm:$0xff]  ;;  %p493_p5 = pnand %p492_p4, %p486_p1 }
  0x2d   :  { %352 = vmatpush3.msra.mxu0 %v89_v3  ;;  %384 = vmatprep.subr.mxu1 %v200_v9  ;;  %v198_v22 = vld [vmem:[#allocation8 + $0x58] sm:$0xff]  ;;  %v196_v24 = vld [vmem:[#allocation8 + $0x48] sm:$0xff]  ;;  %v195_v25 = vld [vmem:[#allocation8 + $0x40] sm:$0xff] }
  0x2e   :  { %353 = vmatprep.subr.mxu0 %v88_v5  ;;  %385 = vmatpush3.msra.mxu1 %v200_v9  ;;  %v194_v26 = vld [vmem:[#allocation8 + $0x38] sm:$0xff]  ;;  %v193_v27 = vld [vmem:[#allocation8 + $0x30] sm:$0xff]  ;;  %v192_v28 = vld [vmem:[#allocation8 + $0x28] sm:$0xff] }
  0x2f   :  { %354 = vmatpush3.msra.mxu0 %v88_v5  ;;  %386 = vmatprep.subr.mxu1 %v199_v21  ;;  %v191_v29 = vld [vmem:[#allocation8 + $0x20] sm:$0xff]  ;;  %v190_v30 = vld [vmem:[#allocation8 + $0x18] sm:$0xff]  ;;  %v189_v31 = vld [vmem:[#allocation8 + $0x10] sm:$0xff] }
  0x30   :  { %355 = vmatprep.subr.mxu0 %v87_v8  ;;  %387 = vmatpush3.msra.mxu1 %v199_v21  ;;  %v188_v32 = vld [vmem:[#allocation8 + $0x8] sm:$0xff]  ;;  %v187_v33 = vld [vmem:[#allocation8] sm:$0xff]  ;;  %v308_v34 = vld [vmem:[%s579_s2] ss:$0 sm:$0xff] }
  0x31   :  { %356 = vmatpush3.msra.mxu0 %v87_v8  ;;  %388 = vmatprep.subr.mxu1 %v198_v22  ;;  %v307_v49 = vld [vmem:[%s581_s4] ss:$0 sm:$0xff] }
  0x32   :  { %357 = vmatprep.subr.mxu0 %v86_v10  ;;  %389 = vmatpush3.msra.mxu1 %v198_v22 }
  0x33   :  { %358 = vmatpush3.msra.mxu0 %v86_v10  ;;  %390 = vmatprep.subr.mxu1 %v197_v23 }
  0x34   :  { %359 = vmatprep.subr.mxu0 %v85_v11  ;;  %391 = vmatpush3.msra.mxu1 %v197_v23 }
  0x35   :  { %360 = vmatpush3.msra.mxu0 %v85_v11  ;;  %392 = vmatprep.subr.mxu1 %v196_v24 }
  0x36   :  { %361 = vmatprep.subr.mxu0 %v84_v12  ;;  %393 = vmatpush3.msra.mxu1 %v196_v24 }
  0x37   :  { %362 = vmatpush3.msra.mxu0 %v84_v12  ;;  %394 = vmatprep.subr.mxu1 %v195_v25 }
  0x38   :  { %363 = vmatprep.subr.mxu0 %v83_v13  ;;  %395 = vmatpush3.msra.mxu1 %v195_v25 }
  0x39   :  { %364 = vmatpush3.msra.mxu0 %v83_v13  ;;  %396 = vmatprep.subr.mxu1 %v194_v26 }
  0x3a   :  { %365 = vmatprep.subr.mxu0 %v82_v14  ;;  %397 = vmatpush3.msra.mxu1 %v194_v26 }
  0x3b   :  { %366 = vmatpush3.msra.mxu0 %v82_v14  ;;  %398 = vmatprep.subr.mxu1 %v193_v27 }
  0x3c   :  { %367 = vmatprep.subr.mxu0 %v81_v15  ;;  %399 = vmatpush3.msra.mxu1 %v193_v27 }
  0x3d   :  { %368 = vmatpush3.msra.mxu0 %v81_v15  ;;  %400 = vmatprep.subr.mxu1 %v192_v28 }
  0x3e   :  { %369 = vmatprep.subr.mxu0 %v80_v16  ;;  %401 = vmatpush3.msra.mxu1 %v192_v28 }
  0x3f   :  { %370 = vmatpush3.msra.mxu0 %v80_v16  ;;  %402 = vmatprep.subr.mxu1 %v191_v29 }
  0x40   :  { %371 = vmatprep.subr.mxu0 %v79_v17  ;;  %403 = vmatpush3.msra.mxu1 %v191_v29 }
  0x41   :  { %372 = vmatpush3.msra.mxu0 %v79_v17  ;;  %404 = vmatprep.subr.mxu1 %v190_v30 }
  0x42   :  { %373 = vmatprep.subr.mxu0 %v78_v18  ;;  %405 = vmatpush3.msra.mxu1 %v190_v30 }
  0x43   :  { %374 = vmatpush3.msra.mxu0 %v78_v18  ;;  %406 = vmatprep.subr.mxu1 %v189_v31 }
  0x44   :  { %375 = vmatprep.subr.mxu0 %v77_v19  ;;  %407 = vmatpush3.msra.mxu1 %v189_v31 }
  0x45   :  { %376 = vmatpush3.msra.mxu0 %v77_v19  ;;  %408 = vmatprep.subr.mxu1 %v188_v32 }
  0x46   :  { %378 = vmatmul.mubr.f32.vlgmr.msra.gmra.mxu0 %v76_v20  ;;  %409 = vmatpush3.msra.mxu1 %v188_v32 }
  0x47   :  { %410 = vmatprep.subr.mxu1 %v187_v33 }
  0x48   :  { %411 = vmatpush3.msra.mxu1 %v187_v33 }
 0x106   :  { %v379_v35 = vpop.f32.mrf.mxu0 }
 0x107   :  { %v172_v36 = vadd.f32 %v379_v35, %v308_v34 }
 0x108   :  { %v166_v37 = vpop.f32.mrf.mxu0 }
 0x109   :  { %v178_v38 = vmul.f32 0.70710677, %v172_v36  ;;  %v167_v39 = vadd.f32 %v308_v34, %v166_v37  ;;  %v176_v46 = vmul.f32 0.5, %v172_v36 }
 0x10b   :  { %421 = verf.f32 %v178_v38  ;;  %v177_v40 = vmul.f32 0.70710677, %v167_v39  ;;  %v175_v44 = vmul.f32 0.5, %v167_v39 }
 0x10d   :  { %423 = verf.f32 %v177_v40 }
 0x118   :  { %v422_v41 = vpop.eup %421 }
 0x119   :  { %v182_v43 = vadd.f32 1.0, %v422_v41 }
 0x11a   :  { %v424_v42 = vpop.eup %423 }
 0x11b   :  { %v181_v45 = vadd.f32 1.0, %v424_v42  ;;  %v184_v48 = vmul.f32 %v182_v43, %v176_v46 }
 0x11d   :  { %v183_v47 = vmul.f32 %v181_v45, %v175_v44 }
 0x11f   :  { %412 = vmatprep.mubr.f32.mxu1 %v183_v47 }
 0x120   :  { %413 = vmatmul.mubr.f32.vlgmr.msra.gmra.mxu1 %v184_v48 }
 0x1e0   :  { %v414_v50 = vpop.f32.mrf.mxu1 }
 0x1e1   :  { %v279_v51 = vadd.f32 %v414_v50, %v307_v49 }
 0x1e2   :  { %v269_v52 = vpop.f32.mrf.mxu1 }
 0x1e3   :  { %288 = vst [vmem:[#allocation9 + $0x8] sm:$0xff] %v279_v51  ;;  %v278_v53 = vadd.f32 %v307_v49, %v269_v52 }
 0x1e5   :  { %287 = vst [vmem:[#allocation9] sm:$0xff] %v278_v53 }
 0x1e6   :  { %496 = shalt.err (!%p493_p5)
}
 0x1e7   :  { %300 = dma.vmem_to_hbm [thread:$0]  %s295_s11, 256, %s582_s5, [#allocation5], %s513_s23, %s513_s23, %s514_s24  }
 0x1e8   :  { %509 = dma.done.wait [#allocation5], 256  }
 0x1e9   :  { %510 = vsyncadd [#allocation5], 4294967040 }
 0x1ea   :  { %304 = vsyncpa [#allocation4], 1 }
 0x1eb   :  { %305 = vsyncpa [#allocation7], 1 }
 0x1ec   :  { %306 = vsyncpa [#allocation5], 1 }

</bundles_post_ra>
